<compile_context>
chip_gen: v7x
topology: tpu7x:2x2x1
jax: 0.10.0
libtpu: 0.0.40
codegen_flags: <defaults>
</compile_context>

<pallas_src>
import math
from functools import partial

import jax
import jax.numpy as jnp
from jax.experimental import pallas as pl
from jax.experimental.pallas import tpu as pltpu


# ---------------------------------------------------------------------------
# Pallas kernel: per-conversation detection core (all timesteps at once).
# ---------------------------------------------------------------------------
def _detect_kernel(s_ref, p_ref, q_ref, mb_ref,
                   w1_ref, w2_ref, bfc_ref, wsm_ref, bsm_ref,
                   out_ref):
    # s_ref / p_ref / q_ref : (1, L, F) VMEM -- bank_s, bank_p, reason(bank_s)
    # mb_ref                : (1, 1, L) VMEM -- additive mask (0 valid / -1e30 pad)
    # w1_ref, w2_ref        : (F, 2F)   VMEM -- fc weight split (bank_s half / r half)
    # bfc_ref               : (1, 2F);  wsm_ref: (2F, C);  bsm_ref: (1, C)
    # out_ref               : (1, L, C) -- log-probabilities for every timestep
    s = s_ref[0]                      # (L, F)
    p = p_ref[0]                      # (L, F)
    q = q_ref[0]                      # (L, F)
    mbias = mb_ref[0]                 # (1, L)

    # scores[t, l] = <q_t, p_l>   (MXU, f32 accumulation)
    scores = jax.lax.dot_general(
        q, p, (((1,), (1,)), ((), ())), preferred_element_type=jnp.float32)
    scores = scores + mbias           # mask padded memory positions

    # segment softmax over memory positions (numerically stable)
    m = jnp.max(scores, axis=-1, keepdims=True)
    e = jnp.exp(scores - m)
    denom = jnp.sum(e, axis=-1, keepdims=True)
    alpha = e * pl.reciprocal(denom, approx=True)          # EUP slot, ~free

    # attention pooling: r[t] = sum_l alpha[t, l] * p_l
    r = jnp.dot(alpha, p, preferred_element_type=jnp.float32)      # (L, F)

    # relu(fc(cat([bank_s[t], r]))) without materialising the concat
    h = (jnp.dot(s, w1_ref[...], preferred_element_type=jnp.float32)
         + jnp.dot(r, w2_ref[...], preferred_element_type=jnp.float32)
         + bfc_ref[...])
    h = jnp.maximum(h, 0.0)

    logits = (jnp.dot(h, wsm_ref[...], preferred_element_type=jnp.float32)
              + bsm_ref[...])                                       # (L, C)
    lmax = jnp.max(logits, axis=-1, keepdims=True)
    lse = lmax + jnp.log(jnp.sum(jnp.exp(logits - lmax), axis=-1, keepdims=True))
    out_ref[0] = (logits - lse).astype(out_ref.dtype)


def _detect_core_pallas(bank_s, bank_p, q, valid, fc_w, fc_b, smax_w, smax_b):
    """Batch-parallel Pallas call. Inputs are batch-major (B, L, F)."""
    B, L, F = bank_s.shape
    C = smax_w.shape[0]

    # fc: Linear(2F, 2F). Splitting its columns turns cat([bank_s[t], r]) @ W^T
    # into two MXU dots (no in-kernel concat).
    w1t = jnp.transpose(fc_w[:, :F])          # (F, 2F) acts on bank_s[t]
    w2t = jnp.transpose(fc_w[:, F:])          # (F, 2F) acts on pooled r
    wsmt = jnp.transpose(smax_w)              # (2F, C)
    bfc = fc_b.reshape(1, 2 * F)
    bsm = smax_b.reshape(1, C)
    mask_bias = jnp.where(valid, 0.0, -1e30).astype(jnp.float32)[:, None, :]

    row_spec = pl.BlockSpec((1, L, F), lambda b: (b, 0, 0))

    def const(a):  # VMEM-resident across the whole grid (constant block index)
        return pl.BlockSpec(a.shape, lambda b: (0, 0))

    flops = B * (4 * L * L * F + 8 * L * F * F + 4 * L * F * C)
    bytes_accessed = int(
        sum(x.size * x.dtype.itemsize
            for x in (bank_s, bank_p, q, mask_bias, w1t, w2t, bfc, wsmt, bsm))
        + B * L * C * bank_s.dtype.itemsize)
    cost = pl.CostEstimate(flops=flops,
                           transcendentals=B * L * (L + C + 2),
                           bytes_accessed=bytes_accessed)

    return pl.pallas_call(
        _detect_kernel,
        grid=(B,),
        in_specs=[row_spec, row_spec, row_spec,
                  pl.BlockSpec((1, 1, L), lambda b: (b, 0, 0)),
                  const(w1t), const(w2t), const(bfc), const(wsmt), const(bsm)],
        out_specs=pl.BlockSpec((1, L, C), lambda b: (b, 0, 0)),
        out_shape=jax.ShapeDtypeStruct((B, L, C), bank_s.dtype),
        compiler_params=pltpu.CompilerParams(
            dimension_semantics=("parallel",),          # 2 TCs on v7x
            vmem_limit_bytes=32 * 1024 * 1024),         # safe on v5e/v6e/v7x
        cost_estimate=cost,
    )(bank_s, bank_p, q, mask_bias, w1t, w2t, bfc, wsmt, bsm)


# ---------------------------------------------------------------------------
# Plain-JAX glue: reason() transformer and the ragged pack/unpack.
# ---------------------------------------------------------------------------
def _layer_norm(x, w, b, eps=1e-5):
    mu = jnp.mean(x, axis=-1, keepdims=True)
    var = jnp.mean(jnp.square(x - mu), axis=-1, keepdims=True)
    return (x - mu) * jax.lax.rsqrt(var + eps) * w + b


def _multi_turn_transformer(x, p, nhead=4):
    """MultiTurnTransformer forward (eval mode) on batch-major x: (B, L, D).

    Matches the PyTorch module, which sees (L, B, D): note its positional
    encoding is built from x.size(1) == batch, i.e. it varies with the batch
    index, not time (quirk of the original code, reproduced exactly).
    """
    B, L, D = x.shape
    h = x @ p["emb_w"].T + p["emb_b"]
    pos = jnp.arange(B, dtype=jnp.float32)[:, None]
    div = jnp.exp(jnp.arange(0, D, 2, dtype=jnp.float32) * (-math.log(10000.0) / D))
    ang = pos * div                                                  # (B, D//2)
    pe = jnp.stack([jnp.sin(ang), jnp.cos(ang)], axis=-1).reshape(B, D)
    h = h + pe[:, None, :]

    # one post-LN nn.TransformerEncoderLayer (nhead=4, ffn=2048, relu), eval mode
    dh = D // nhead
    qkv = h @ p["attn_in_w"].T + p["attn_in_b"]                      # (B, L, 3D)
    qh, kh, vh = [t.reshape(B, L, nhead, dh).transpose(0, 2, 1, 3)
                  for t in jnp.split(qkv, 3, axis=-1)]
    att = jax.nn.softmax(
        jnp.einsum("bhqd,bhkd->bhqk", qh, kh) / math.sqrt(dh), axis=-1)
    ctx = jnp.einsum("bhqk,bhkd->bhqd", att, vh).transpose(0, 2, 1, 3).reshape(B, L, D)
    attn = ctx @ p["attn_out_w"].T + p["attn_out_b"]
    y = _layer_norm(h + attn, p["ln1_w"], p["ln1_b"])
    ffn = jnp.maximum(y @ p["ffn_w1"].T + p["ffn_b1"], 0.0) @ p["ffn_w2"].T + p["ffn_b2"]
    y = _layer_norm(y + ffn, p["ln2_w"], p["ln2_b"])
    return h + y                     # forward(): x = x + transformer_encoder(x)


def _build_banks(U_s, U_p, seq_lengths):
    """pack + feature_transfer, built directly batch-major: (B, L, F)."""
    L = max(seq_lengths)
    lengths = jnp.asarray(seq_lengths, dtype=jnp.int32)
    valid = jnp.arange(L, dtype=jnp.int32)[None, :] < lengths[:, None]    # (B, L)
    # The padding-mask multiply is mandatory (padded rows must be exact zeros:
    # they take part in the unmasked transformer attention); the layout change
    # to batch-major fuses into that same pass -- no extra HBM traffic.
    bank_s = jnp.where(valid[:, :, None], jnp.transpose(U_s[:L], (1, 0, 2)), 0.0)
    bank_p = jnp.where(valid[:, :, None], jnp.transpose(U_p[:L], (1, 0, 2)), 0.0)
    return bank_s, bank_p, valid


@partial(jax.jit, static_argnames=("seq_lengths",))
def detective_network_forward(U_s, U_p, params, *, seq_lengths):
    """DetectiveNetwork.forward (eval mode). U_s, U_p: (seq, batch, n_features)."""
    bank_s, bank_p, valid = _build_banks(U_s, U_p, seq_lengths)
    # reason() does not depend on t in eval mode (dropout is a no-op), so it is
    # hoisted out of the per-timestep loop and computed once.
    q = _multi_turn_transformer(bank_s, params["reason"])
    logp = _detect_core_pallas(bank_s, bank_p, q, valid,
                               params["fc_w"], params["fc_b"],
                               params["smax_w"], params["smax_b"])    # (B, L, C)
    # flatten exactly like the PyTorch module: conversation j's first L_j steps
    return jnp.concatenate(
        [logp[j, :seq_lengths[j]] for j in range(len(seq_lengths))], axis=0)


# ---------------------------------------------------------------------------
# Pure-JAX reference of the detection core (for validation).
# ---------------------------------------------------------------------------
def _reference_forward(U_s, U_p, params, seq_lengths):
    bank_s, bank_p, valid = _build_banks(U_s, U_p, seq_lengths)
    q = _multi_turn_transformer(bank_s, params["reason"])
    scores = jnp.einsum("btf,blf->btl", q, bank_p)
    scores = jnp.where(valid[:, None, :], scores, -jnp.inf)
    alpha = jax.nn.softmax(scores, axis=-1)
    r = jnp.einsum("btl,blf->btf", alpha, bank_p)
    cat = jnp.concatenate([bank_s, r], axis=-1)
    hid = jax.nn.relu(cat @ params["fc_w"].T + params["fc_b"])
    logits = hid @ params["smax_w"].T + params["smax_b"]
    logp = jax.nn.log_softmax(logits, axis=-1)
    return jnp.concatenate(
        [logp[j, :seq_lengths[j]] for j in range(len(seq_lengths))], axis=0)


if __name__ == "__main__":
    # Small shapes consistent with the module: n_features lane-aligned (128),
    # max conversation length a multiple of 8, default n_classes = 7.
    n_features, n_classes = 128, 7
    seq_lengths = (8, 5, 7)
    batch = len(seq_lengths)
    max_seq = max(seq_lengths)
    F = n_features

    key = jax.random.PRNGKey(0)
    ks = jax.random.split(key, 16)
    f32 = jnp.float32

    def w(k, shape, scale):
        return jax.random.normal(k, shape, dtype=f32) * scale

    params = {
        "reason": {
            "emb_w": w(ks[0], (F, F), 1.0 / math.sqrt(F)),
            "emb_b": w(ks[1], (F,), 0.01),
            "attn_in_w": w(ks[2], (3 * F, F), 1.0 / math.sqrt(F)),
            "attn_in_b": w(ks[3], (3 * F,), 0.01),
            "attn_out_w": w(ks[4], (F, F), 1.0 / math.sqrt(F)),
            "attn_out_b": w(ks[5], (F,), 0.01),
            "ln1_w": jnp.ones((F,), f32), "ln1_b": jnp.zeros((F,), f32),
            "ffn_w1": w(ks[6], (2048, F), 1.0 / math.sqrt(F)),
            "ffn_b1": w(ks[7], (2048,), 0.01),
            "ffn_w2": w(ks[8], (F, 2048), 1.0 / math.sqrt(2048)),
            "ffn_b2": w(ks[9], (F,), 0.01),
            "ln2_w": jnp.ones((F,), f32), "ln2_b": jnp.zeros((F,), f32),
        },
        "fc_w": w(ks[10], (2 * F, 2 * F), 1.0 / math.sqrt(2 * F)),
        "fc_b": w(ks[11], (2 * F,), 0.01),
        "smax_w": w(ks[12], (n_classes, 2 * F), 1.0 / math.sqrt(2 * F)),
        "smax_b": w(ks[13], (n_classes,), 0.01),
    }
    U_s = jax.random.normal(ks[14], (max_seq, batch, F), dtype=f32) * 0.5
    U_p = jax.random.normal(ks[15], (max_seq, batch, F), dtype=f32) * 0.1

    out = detective_network_forward(U_s, U_p, params, seq_lengths=seq_lengths)
    out = jax.block_until_ready(out)

    total = sum(seq_lengths)
    assert out.shape == (total, n_classes), out.shape
    assert bool(jnp.all(jnp.isfinite(out)))
    # log-probabilities must normalise per utterance
    assert bool(jnp.allclose(jnp.sum(jnp.exp(out), axis=-1), 1.0, atol=1e-3))

    ref = jax.block_until_ready(_reference_forward(U_s, U_p, params, seq_lengths))
    max_err = float(jnp.max(jnp.abs(out - ref)))
    assert jnp.allclose(out, ref, atol=2e-2, rtol=2e-2), max_err

    print("KERNEL_OK")
</pallas_src>

<mosaic_0001>
module attributes {stable_mosaic.version = 11 : i64} {
  func.func @_detect_kernel(%arg0: i32, %arg1: memref<1x8x128xf32, #tpu.memory_space<vmem>>, %arg2: memref<1x8x128xf32, #tpu.memory_space<vmem>>, %arg3: memref<1x8x128xf32, #tpu.memory_space<vmem>>, %arg4: memref<1x1x8xf32, #tpu.memory_space<vmem>>, %arg5: memref<128x256xf32, #tpu.memory_space<vmem>>, %arg6: memref<128x256xf32, #tpu.memory_space<vmem>>, %arg7: memref<1x256xf32, #tpu.memory_space<vmem>>, %arg8: memref<256x7xf32, #tpu.memory_space<vmem>>, %arg9: memref<1x7xf32, #tpu.memory_space<vmem>>, %arg10: memref<1x8x7xf32, #tpu.memory_space<vmem>>) attributes {dimension_semantics = [#tpu.dimension_semantics<parallel>], iteration_bounds = array<i64: 3>, scalar_prefetch = 0 : i64, scratch_operands = 0 : i64, tpu.core_type = #tpu.core_type<tc>, window_params = [{transform_indices = @transform_0, window_bounds = array<i64: 1, 8, 128>}, {transform_indices = @transform_1, window_bounds = array<i64: 1, 8, 128>}, {transform_indices = @transform_2, window_bounds = array<i64: 1, 8, 128>}, {transform_indices = @transform_3, window_bounds = array<i64: 1, 1, 8>}, {pipeline_mode = #tpu.pipeline_mode<synchronous>, transform_indices = @transform_4, window_bounds = array<i64: 128, 256>}, {pipeline_mode = #tpu.pipeline_mode<synchronous>, transform_indices = @transform_5, window_bounds = array<i64: 128, 256>}, {pipeline_mode = #tpu.pipeline_mode<synchronous>, transform_indices = @transform_6, window_bounds = array<i64: 1, 256>}, {pipeline_mode = #tpu.pipeline_mode<synchronous>, transform_indices = @transform_7, window_bounds = array<i64: 256, 7>}, {pipeline_mode = #tpu.pipeline_mode<synchronous>, transform_indices = @transform_8, window_bounds = array<i64: 1, 7>}, {transform_indices = @transform_9, window_bounds = array<i64: 1, 8, 7>}]} {
    %c0 = arith.constant 0 : index
    %c0_0 = arith.constant 0 : index
    %c0_1 = arith.constant 0 : index
    %0 = vector.load %arg1[%c0, %c0_0, %c0_1] : memref<1x8x128xf32, #tpu.memory_space<vmem>>, vector<1x8x128xf32>
    %1 = vector.shape_cast %0 : vector<1x8x128xf32> to vector<8x128xf32>
    %c0_2 = arith.constant 0 : index
    %c0_3 = arith.constant 0 : index
    %c0_4 = arith.constant 0 : index
    %2 = vector.load %arg2[%c0_2, %c0_3, %c0_4] : memref<1x8x128xf32, #tpu.memory_space<vmem>>, vector<1x8x128xf32>
    %3 = vector.shape_cast %2 : vector<1x8x128xf32> to vector<8x128xf32>
    %c0_5 = arith.constant 0 : index
    %c0_6 = arith.constant 0 : index
    %c0_7 = arith.constant 0 : index
    %4 = vector.load %arg3[%c0_5, %c0_6, %c0_7] : memref<1x8x128xf32, #tpu.memory_space<vmem>>, vector<1x8x128xf32>
    %5 = vector.shape_cast %4 : vector<1x8x128xf32> to vector<8x128xf32>
    %c0_8 = arith.constant 0 : index
    %c0_9 = arith.constant 0 : index
    %c0_10 = arith.constant 0 : index
    %6 = vector.load %arg4[%c0_8, %c0_9, %c0_10] : memref<1x1x8xf32, #tpu.memory_space<vmem>>, vector<1x1x8xf32>
    %7 = vector.shape_cast %6 : vector<1x1x8xf32> to vector<1x8xf32>
    %cst = arith.constant dense<0.000000e+00> : vector<8x8xf32>
    %8 = tpu.matmul %5, %3, %cst {dimension_numbers = #tpu.dot_dimension_numbers<[1], [1], [0], [0], [0, 0, 1, 0], [], []>} : vector<8x128xf32>, vector<8x128xf32>, vector<8x8xf32> -> vector<8x8xf32>
    %9 = vector.broadcast %7 : vector<1x8xf32> to vector<8x8xf32>
    %10 = arith.addf %8, %9 : vector<8x8xf32>
    %cst_11 = arith.constant dense<0xFF800000> : vector<8xf32>
    %11 = vector.multi_reduction <maximumf>, %10, %cst_11 [1] : vector<8x8xf32> to vector<8xf32>
    %12 = vector.shape_cast %11 : vector<8xf32> to vector<8x1xf32>
    %13 = vector.broadcast %12 : vector<8x1xf32> to vector<8x8xf32>
    %14 = arith.subf %10, %13 : vector<8x8xf32>
    %15 = math.exp %14 : vector<8x8xf32>
    %cst_12 = arith.constant dense<0.000000e+00> : vector<8xf32>
    %16 = vector.multi_reduction <add>, %15, %cst_12 [1] : vector<8x8xf32> to vector<8xf32>
    %17 = vector.shape_cast %16 : vector<8xf32> to vector<8x1xf32>
    %18 = tpu.reciprocal %17 {approx = true} : vector<8x1xf32> -> vector<8x1xf32>
    %19 = vector.broadcast %18 : vector<8x1xf32> to vector<8x8xf32>
    %20 = arith.mulf %15, %19 : vector<8x8xf32>
    %cst_13 = arith.constant dense<0.000000e+00> : vector<8x128xf32>
    %21 = tpu.matmul %20, %3, %cst_13 {dimension_numbers = #tpu.dot_dimension_numbers<[1], [0], [0], [1], [0, 0, 1, 1], [], []>} : vector<8x8xf32>, vector<8x128xf32>, vector<8x128xf32> -> vector<8x128xf32>
    %c0_14 = arith.constant 0 : index
    %c0_15 = arith.constant 0 : index
    %22 = vector.load %arg5[%c0_14, %c0_15] : memref<128x256xf32, #tpu.memory_space<vmem>>, vector<128x256xf32>
    %cst_16 = arith.constant dense<0.000000e+00> : vector<8x256xf32>
    %23 = tpu.matmul %1, %22, %cst_16 {dimension_numbers = #tpu.dot_dimension_numbers<[1], [0], [0], [1], [0, 0, 1, 1], [], []>} : vector<8x128xf32>, vector<128x256xf32>, vector<8x256xf32> -> vector<8x256xf32>
    %c0_17 = arith.constant 0 : index
    %c0_18 = arith.constant 0 : index
    %24 = vector.load %arg6[%c0_17, %c0_18] : memref<128x256xf32, #tpu.memory_space<vmem>>, vector<128x256xf32>
    %cst_19 = arith.constant dense<0.000000e+00> : vector<8x256xf32>
    %25 = tpu.matmul %21, %24, %cst_19 {dimension_numbers = #tpu.dot_dimension_numbers<[1], [0], [0], [1], [0, 0, 1, 1], [], []>} : vector<8x128xf32>, vector<128x256xf32>, vector<8x256xf32> -> vector<8x256xf32>
    %26 = arith.addf %23, %25 : vector<8x256xf32>
    %c0_20 = arith.constant 0 : index
    %c0_21 = arith.constant 0 : index
    %27 = vector.load %arg7[%c0_20, %c0_21] : memref<1x256xf32, #tpu.memory_space<vmem>>, vector<1x256xf32>
    %28 = vector.broadcast %27 : vector<1x256xf32> to vector<8x256xf32>
    %29 = arith.addf %26, %28 : vector<8x256xf32>
    %cst_22 = arith.constant 0.000000e+00 : f32
    %30 = vector.broadcast %cst_22 : f32 to vector<8x256xf32>
    %31 = arith.maximumf %29, %30 : vector<8x256xf32>
    %c0_23 = arith.constant 0 : index
    %c0_24 = arith.constant 0 : index
    %32 = vector.load %arg8[%c0_23, %c0_24] : memref<256x7xf32, #tpu.memory_space<vmem>>, vector<256x7xf32>
    %cst_25 = arith.constant dense<0.000000e+00> : vector<8x7xf32>
    %33 = tpu.matmul %31, %32, %cst_25 {dimension_numbers = #tpu.dot_dimension_numbers<[1], [0], [0], [1], [0, 0, 1, 1], [], []>} : vector<8x256xf32>, vector<256x7xf32>, vector<8x7xf32> -> vector<8x7xf32>
    %c0_26 = arith.constant 0 : index
    %c0_27 = arith.constant 0 : index
    %34 = vector.load %arg9[%c0_26, %c0_27] : memref<1x7xf32, #tpu.memory_space<vmem>>, vector<1x7xf32>
    %35 = vector.broadcast %34 : vector<1x7xf32> to vector<8x7xf32>
    %36 = arith.addf %33, %35 : vector<8x7xf32>
    %cst_28 = arith.constant dense<0xFF800000> : vector<8xf32>
    %37 = vector.multi_reduction <maximumf>, %36, %cst_28 [1] : vector<8x7xf32> to vector<8xf32>
    %38 = vector.shape_cast %37 : vector<8xf32> to vector<8x1xf32>
    %39 = vector.broadcast %38 : vector<8x1xf32> to vector<8x7xf32>
    %40 = arith.subf %36, %39 : vector<8x7xf32>
    %41 = math.exp %40 : vector<8x7xf32>
    %cst_29 = arith.constant dense<0.000000e+00> : vector<8xf32>
    %42 = vector.multi_reduction <add>, %41, %cst_29 [1] : vector<8x7xf32> to vector<8xf32>
    %43 = vector.shape_cast %42 : vector<8xf32> to vector<8x1xf32>
    %44 = math.log %43 : vector<8x1xf32>
    %45 = arith.addf %38, %44 : vector<8x1xf32>
    %46 = vector.broadcast %45 : vector<8x1xf32> to vector<8x7xf32>
    %47 = arith.subf %36, %46 : vector<8x7xf32>
    %c0_30 = arith.constant 0 : index
    %c0_31 = arith.constant 0 : index
    %c0_32 = arith.constant 0 : index
    %48 = vector.load %arg10[%c0_30, %c0_31, %c0_32] : memref<1x8x7xf32, #tpu.memory_space<vmem>>, vector<1x8x7xf32>
    %49 = vector.shape_cast %48 : vector<1x8x7xf32> to vector<8x7xf32>
    %50 = vector.shape_cast %47 : vector<8x7xf32> to vector<1x8x7xf32>
    tpu.vector_store %arg10[%c0_30, %c0_31, %c0_32], %50 {strides = array<i32>} : memref<1x8x7xf32, #tpu.memory_space<vmem>>, vector<1x8x7xf32>,
    return
  }
  func.func @transform_0(%arg0: i32) -> (i32, i32, i32) {
    %c0_i32 = arith.constant 0 : i32
    %c0_i32_0 = arith.constant 0 : i32
    %c0_i32_1 = arith.constant 0 : i32
    return %arg0, %c0_i32, %c0_i32_0 : i32, i32, i32
  }
  func.func @transform_1(%arg0: i32) -> (i32, i32, i32) {
    %c0_i32 = arith.constant 0 : i32
    %c0_i32_0 = arith.constant 0 : i32
    %c0_i32_1 = arith.constant 0 : i32
    return %arg0, %c0_i32, %c0_i32_0 : i32, i32, i32
  }
  func.func @transform_2(%arg0: i32) -> (i32, i32, i32) {
    %c0_i32 = arith.constant 0 : i32
    %c0_i32_0 = arith.constant 0 : i32
    %c0_i32_1 = arith.constant 0 : i32
    return %arg0, %c0_i32, %c0_i32_0 : i32, i32, i32
  }
  func.func @transform_3(%arg0: i32) -> (i32, i32, i32) {
    %c0_i32 = arith.constant 0 : i32
    %c0_i32_0 = arith.constant 0 : i32
    %c0_i32_1 = arith.constant 0 : i32
    return %arg0, %c0_i32, %c0_i32_0 : i32, i32, i32
  }
  func.func @transform_4(%arg0: i32) -> (i32, i32) {
    %c0_i32 = arith.constant 0 : i32
    %c0_i32_0 = arith.constant 0 : i32
    %c0_i32_1 = arith.constant 0 : i32
    return %c0_i32, %c0_i32_0 : i32, i32
  }
  func.func @transform_5(%arg0: i32) -> (i32, i32) {
    %c0_i32 = arith.constant 0 : i32
    %c0_i32_0 = arith.constant 0 : i32
    %c0_i32_1 = arith.constant 0 : i32
    return %c0_i32, %c0_i32_0 : i32, i32
  }
  func.func @transform_6(%arg0: i32) -> (i32, i32) {
    %c0_i32 = arith.constant 0 : i32
    %c0_i32_0 = arith.constant 0 : i32
    %c0_i32_1 = arith.constant 0 : i32
    return %c0_i32, %c0_i32_0 : i32, i32
  }
  func.func @transform_7(%arg0: i32) -> (i32, i32) {
    %c0_i32 = arith.constant 0 : i32
    %c0_i32_0 = arith.constant 0 : i32
    %c0_i32_1 = arith.constant 0 : i32
    return %c0_i32, %c0_i32_0 : i32, i32
  }
  func.func @transform_8(%arg0: i32) -> (i32, i32) {
    %c0_i32 = arith.constant 0 : i32
    %c0_i32_0 = arith.constant 0 : i32
    %c0_i32_1 = arith.constant 0 : i32
    return %c0_i32, %c0_i32_0 : i32, i32
  }
  func.func @transform_9(%arg0: i32) -> (i32, i32, i32) {
    %c0_i32 = arith.constant 0 : i32
    %c0_i32_0 = arith.constant 0 : i32
    %c0_i32_1 = arith.constant 0 : i32
    return %arg0, %c0_i32, %c0_i32_0 : i32, i32, i32
  }
}

</mosaic_0001>

<bundles_post_ra>
// kernel: detective_network_forward.1
= control target key start
LH: loop header
LB: loop body
LE: loop exit
PB: predicated region body
PF: predicated region fallthrough
CT: control target
= control target key end

     0   :  { %s1212_s30 = smov 0   ;;  %s1554_s0 = inlined_call_operand.vmem [shape: f32[3,8,128], index: 0, kind: input, shape index: {}]   ;;  %s1555_s1 = inlined_call_operand.vmem [shape: f32[3,8,128], index: 1, kind: input, shape index: {}]   ;;  %s1556_s2 = inlined_call_operand.vmem [shape: f32[3,8,128], index: 2, kind: input, shape index: {}]   ;;  %s1557_s3 = inlined_call_operand.vmem [shape: f32[3,1,8], index: 3, kind: input, shape index: {}]   ;;  %s1558_s4 = inlined_call_operand.vmem [shape: f32[128,256], index: 4, kind: input, shape index: {}]   ;;  %s1559_s5 = inlined_call_operand.vmem [shape: f32[128,256], index: 5, kind: input, shape index: {}]   ;;  %s1560_s6 = inlined_call_operand.vmem [shape: f32[1,256], index: 6, kind: input, shape index: {}]   ;;  %s1561_s7 = inlined_call_operand.vmem [shape: f32[256,7], index: 7, kind: input, shape index: {}]   ;;  %s1562_s8 = inlined_call_operand.vmem [shape: f32[1,7], index: 8, kind: input, shape index: {}]   ;;  %s1563_s9 = inlined_call_operand.vmem [shape: f32[3,8,7], index: 9, kind: output, shape index: {}]  }
   0x1 LB: > { %s973_s10 = sadd.s32 4294967295, %s1158_s30   ;;  %p977_p0 = scmp.ge.s32.totalorder %s1158_s30, 1  ;;  %s1158_s30 = sphi %s1212_s30, %s19_s30  }
   0x2   : > { %p312_p1 = scmp.lt.s32.totalorder %s1158_s30, 4 }
   0x4   : > { %p313_p2 = pnand %p977_p0, %p312_p1 }
   0x5   : > { %p357_p3 = scmp.lt.s32.totalorder (!%p313_p2), %s973_s10, 2  ;;  %v1160_v0 = vmov (!%p313_p2), 0.0   ;;  %vm1161_vm0 = vmmov (!%p313_p2), 0   ;;  %vm456_vm1 = vcmask (!%p313_p2), 64512   ;;  %v574_v13 = vld [vmem:[%s1559_s5 + $0x8] sm:$0xff] (!%p313_p2)  ;;  %v576_v14 = vld [vmem:[%s1559_s5 + $0x18] sm:$0xff] (!%p313_p2) }
   0x6   : > { %316 = sbr.rel (%p313_p2) target bundleno = 1546 (0x60a), region = 56  ;;  %1026 = vmatprep.subr.mxu0 (!%p313_p2), %v1160_v0  ;;  %1028 = vmatprep.mubr.msk.f32.mxu0 (!%p313_p2), %vm1161_vm0, %v1160_v0  ;;  %v573_v15 = vld [vmem:[%s1559_s5] sm:$0xff] (!%p313_p2)  ;;  %v1036_v16 = vpack.c.bf16 (!%p313_p2), %v576_v14, %v574_v13  ;;  %v575_v17 = vld [vmem:[%s1559_s5 + $0x10] sm:$0xff] (!%p313_p2)  ;;  %v578_v18 = vld [vmem:[%s1559_s5 + $0x28] sm:$0xff] (!%p313_p2)  ;;  %vm872_vm2 = vcmask (!%p313_p2), 56320  }
   0x7   : > { %669 = vmatprep.mubr.f32.mxu1 (!%p313_p2), %v1160_v0  ;;  %v580_v19 = vld [vmem:[%s1559_s5 + $0x38] sm:$0xff] (!%p313_p2)  ;;  %v1038_v20 = vpack.c.bf16 (!%p313_p2), %v575_v17, %v573_v15  ;;  %v577_v22 = vld [vmem:[%s1559_s5 + $0x20] sm:$0xff] (!%p313_p2)  ;;  %v579_v23 = vld [vmem:[%s1559_s5 + $0x30] sm:$0xff] (!%p313_p2) }
   0x8   : > { %v1040_v21 = vpack.c.bf16 (!%p313_p2), %v580_v19, %v578_v18  ;;  %v582_v24 = vld [vmem:[%s1559_s5 + $0x48] sm:$0xff] (!%p313_p2)  ;;  %1037 = vmatprep.subr.bf16.mxu1 (!%p313_p2), %v1036_v16  ;;  %v584_v25 = vld [vmem:[%s1559_s5 + $0x58] sm:$0xff] (!%p313_p2)  ;;  %v1042_v26 = vpack.c.bf16 (!%p313_p2), %v579_v23, %v577_v22  ;;  %v581_v28 = vld [vmem:[%s1559_s5 + $0x40] sm:$0xff] (!%p313_p2) }
   0x9   : > { %1039 = vmatpush1.bf16.msra.mxu1 (!%p313_p2), %v1038_v20  ;;  %v1044_v27 = vpack.c.bf16 (!%p313_p2), %v584_v25, %v582_v24  ;;  %v583_v29 = vld [vmem:[%s1559_s5 + $0x50] sm:$0xff] (!%p313_p2)  ;;  %v586_v30 = vld [vmem:[%s1559_s5 + $0x68] sm:$0xff] (!%p313_p2)  ;;  %v588_v31 = vld [vmem:[%s1559_s5 + $0x78] sm:$0xff] (!%p313_p2) }
   0xa   : > { %1041 = vmatprep.subr.bf16.mxu1 (!%p313_p2), %v1040_v21  ;;  %v1046_v32 = vpack.c.bf16 (!%p313_p2), %v583_v29, %v581_v28  ;;  %v1048_v33 = vpack.c.bf16 (!%p313_p2), %v588_v31, %v586_v30  ;;  %v585_v34 = vld [vmem:[%s1559_s5 + $0x60] sm:$0xff] (!%p313_p2)  ;;  %v587_v35 = vld [vmem:[%s1559_s5 + $0x70] sm:$0xff] (!%p313_p2)  ;;  %v590_v36 = vld [vmem:[%s1559_s5 + $0x88] sm:$0xff] (!%p313_p2) }
   0xb   : > { %v592_v37 = vld [vmem:[%s1559_s5 + $0x98] sm:$0xff] (!%p313_p2)  ;;  %v1050_v38 = vpack.c.bf16 (!%p313_p2), %v587_v35, %v585_v34  ;;  %v589_v40 = vld [vmem:[%s1559_s5 + $0x80] sm:$0xff] (!%p313_p2)  ;;  %v591_v41 = vld [vmem:[%s1559_s5 + $0x90] sm:$0xff] (!%p313_p2) }
   0xc   : > { %v1052_v39 = vpack.c.bf16 (!%p313_p2), %v592_v37, %v590_v36  ;;  %v594_v42 = vld [vmem:[%s1559_s5 + $0xa8] sm:$0xff] (!%p313_p2)  ;;  %v596_v43 = vld [vmem:[%s1559_s5 + $0xb8] sm:$0xff] (!%p313_p2)  ;;  %v1054_v44 = vpack.c.bf16 (!%p313_p2), %v591_v41, %v589_v40  ;;  %v593_v46 = vld [vmem:[%s1559_s5 + $0xa0] sm:$0xff] (!%p313_p2) }
   0xd   : > { %s1565_s10 = smov (!%p357_p3, %s973_s10), 2  ;;  %1043 = vmatpush1.bf16.msra.mxu1 %v1042_v26  ;;  %v1056_v45 = vpack.c.bf16 %v596_v43, %v594_v42  ;;  %v595_v47 = vld [vmem:[%s1559_s5 + $0xb0] sm:$0xff]  ;;  %v598_v48 = vld [vmem:[%s1559_s5 + $0xc8] sm:$0xff]  ;;  %v600_v49 = vld [vmem:[%s1559_s5 + $0xd8] sm:$0xff] }
   0xe   : > { %s1223_s11 = sshll.u32 %s1565_s10, 3  ;;  %s371_s20 = scalar_lea.vmem %s1557_s3, %s1565_s10  ;;  %1045 = vmatprep.subr.bf16.mxu1 %v1044_v27  ;;  %v1058_v50 = vpack.c.bf16 %v595_v47, %v593_v46  ;;  %v1060_v51 = vpack.c.bf16 %v600_v49, %v598_v48  ;;  %v597_v52 = vld [vmem:[%s1559_s5 + $0xc0] sm:$0xff]  ;;  %v599_v53 = vld [vmem:[%s1559_s5 + $0xd0] sm:$0xff]  ;;  %v602_v54 = vld [vmem:[%s1559_s5 + $0xe8] sm:$0xff] }
   0xf   : > { %s364_s14 = scalar_lea.vmem %s1555_s1, %s1223_s11  ;;  %s368_s17 = scalar_lea.vmem %s1556_s2, %s1223_s11  ;;  %v982_v3 = vld [vmem:[%s371_s20] ss:$0 sm:$0xff]  ;;  %v604_v55 = vld [vmem:[%s1559_s5 + $0xf8] sm:$0xff]  ;;  %v1062_v56 = vpack.c.bf16 %v599_v53, %v597_v52  ;;  %v603_v59 = vld [vmem:[%s1559_s5 + $0xf0] sm:$0xff] }
  0x10   : > { %v377_v1 = vld [vmem:[%s364_s14] sm:$0xff]  ;;  %v1064_v57 = vpack.c.bf16 %v604_v55, %v602_v54  ;;  %v765_v13 = vld [vmem:[%s1561_s7 + $0x10] sm:$0xff]  ;;  %v766_v14 = vld [vmem:[%s1561_s7 + $0x18] sm:$0xff]  ;;  %s360_s13 = scalar_lea.vmem %s1554_s0, %s1223_s11 }
  0x11   : > { %1027 = vmatpush3.xpose.msra.mxu0 %v377_v1  ;;  %v378_v2 = vld [vmem:[%s368_s17] sm:$0xff]  ;;  %1047 = vmatpush1.bf16.msra.mxu1 %v1046_v32  ;;  %v784_v16 = vld [vmem:[%s1561_s7 + $0xa8] sm:$0xff]  ;;  %v1106_v17 = vpack.c.bf16 %v766_v14, %v765_v13  ;;  %v785_v21 = vld [vmem:[%s1561_s7 + $0xb0] sm:$0xff] }
  0x12   : > { %1031 = vmatprep.subr.mxu0 %v1160_v0  ;;  %1049 = vmatprep.subr.bf16.mxu1 %v1048_v33  ;;  %v601_v58 = vld [vmem:[%s1559_s5 + $0xe0] sm:$0xff]  ;;  %v768_v20 = vld [vmem:[%s1561_s7 + $0x28] sm:$0xff]  ;;  %v786_v22 = vld [vmem:[%s1561_s7 + $0xb8] sm:$0xff] }
  0x13   : > { %v1066_v60 = vpack.c.bf16 %v603_v59, %v601_v58  ;;  %v783_v15 = vld [vmem:[%s1561_s7 + $0xa0] sm:$0xff]  ;;  %v1112_v24 = vpack.c.bf16 %v786_v22, %v785_v21  ;;  %v769_v25 = vld [vmem:[%s1561_s7 + $0x30] sm:$0xff]  ;;  %v770_v26 = vld [vmem:[%s1561_s7 + $0x38] sm:$0xff] }
  0x14   : > { %1029 = vmatmul.mubr.f32.vlgmr.msra.gmra.mrb[0].mxu0 %v378_v2  ;;  %v544_v2 = vld [vmem:[%s1558_s4 + $0x18] sm:$0xff]  ;;  %v1108_v18 = vpack.c.bf16 %v784_v16, %v783_v15  ;;  %v767_v19 = vld [vmem:[%s1561_s7 + $0x20] sm:$0xff]  ;;  %v788_v28 = vld [vmem:[%s1561_s7 + $0xc8] sm:$0xff]  ;;  %v1114_v29 = vpack.c.bf16 %v770_v26, %v769_v25 }
  0x15   : > { %1032 = vmatpush3.msra.mxu0 %v377_v1  ;;  %1033 = vmatprep.mubr.msk.f32.mxu0 %vm1161_vm0, %v1160_v0  ;;  %v542_v1 = vld [vmem:[%s1558_s4 + $0x8] sm:$0xff]  ;;  %v1110_v23 = vpack.c.bf16 %v768_v20, %v767_v19  ;;  %v787_v27 = vld [vmem:[%s1561_s7 + $0xc0] sm:$0xff]  ;;  %v789_v33 = vld [vmem:[%s1561_s7 + $0xd0] sm:$0xff] }
  0x16   : > { %1051 = vmatpush1.bf16.msra.mxu1 %v1050_v38  ;;  %v1116_v30 = vpack.c.bf16 %v788_v28, %v787_v27  ;;  %v771_v31 = vld [vmem:[%s1561_s7 + $0x40] sm:$0xff]  ;;  %v772_v32 = vld [vmem:[%s1561_s7 + $0x48] sm:$0xff]  ;;  %v790_v34 = vld [vmem:[%s1561_s7 + $0xd8] sm:$0xff] }
  0x17   : > { %1053 = vmatprep.subr.bf16.mxu1 %v1052_v39  ;;  %v1118_v35 = vpack.c.bf16 %v772_v32, %v771_v31  ;;  %v1120_v36 = vpack.c.bf16 %v790_v34, %v789_v33  ;;  %v773_v37 = vld [vmem:[%s1561_s7 + $0x50] sm:$0xff]  ;;  %v774_v38 = vld [vmem:[%s1561_s7 + $0x58] sm:$0xff]  ;;  %v791_v39 = vld [vmem:[%s1561_s7 + $0xe0] sm:$0xff] }
  0x18   : > { %v792_v40 = vld [vmem:[%s1561_s7 + $0xe8] sm:$0xff]  ;;  %v1122_v41 = vpack.c.bf16 %v774_v38, %v773_v37  ;;  %v541_v43 = vld [vmem:[%s1558_s4] sm:$0xff]  ;;  %v548_v46 = vld [vmem:[%s1558_s4 + $0x38] sm:$0xff] }
  0x19   : > { %v1124_v42 = vpack.c.bf16 %v792_v40, %v791_v39  ;;  %v545_v49 = vld [vmem:[%s1558_s4 + $0x20] sm:$0xff]  ;;  %v550_v52 = vld [vmem:[%s1558_s4 + $0x48] sm:$0xff]  ;;  %v552_v53 = vld [vmem:[%s1558_s4 + $0x58] sm:$0xff] }
  0x1a   : > { %1055 = vmatpush1.bf16.msra.mxu1 %v1054_v44  ;;  %v543_v44 = vld [vmem:[%s1558_s4 + $0x10] sm:$0xff]  ;;  %v554_v59 = vld [vmem:[%s1558_s4 + $0x68] sm:$0xff]  ;;  %v568_v14 = vld [vmem:[%s1558_s4 + $0xd8] sm:$0xff] }
  0x1b   : > { %1057 = vmatprep.subr.bf16.mxu1 %v1056_v45  ;;  %v546_v45 = vld [vmem:[%s1558_s4 + $0x28] sm:$0xff]  ;;  %v1070_v47 = vpack.c.bf16 %v543_v44, %v541_v43  ;;  %v551_v58 = vld [vmem:[%s1558_s4 + $0x50] sm:$0xff]  ;;  %v572_v20 = vld [vmem:[%s1558_s4 + $0xf8] sm:$0xff] }
  0x1c   : > { %v1072_v48 = vpack.c.bf16 %v548_v46, %v546_v45  ;;  %v566_v13 = vld [vmem:[%s1558_s4 + $0xc8] sm:$0xff]  ;;  %v376_v26 = vld [vmem:[%s360_s13] sm:$0xff]  ;;  %v794_v31 = vld [vmem:[%s1561_s7 + $0xf8] sm:$0xff]  ;;  %s375_s13 = scalar_lea.vmem %s1563_s9, %s1223_s11 }
  0x1d   : > { %v1092_v16 = vpack.c.bf16 %v568_v14, %v566_v13  ;;  %v570_v19 = vld [vmem:[%s1558_s4 + $0xe8] sm:$0xff]  ;;  %v775_v27 = vld [vmem:[%s1561_s7 + $0x60] sm:$0xff]  ;;  %v777_v33 = vld [vmem:[%s1561_s7 + $0x70] sm:$0xff] }
  0x1e   : > { %1059 = vmatpush1.bf16.msra.mxu1 %v1058_v50  ;;  %v547_v50 = vld [vmem:[%s1558_s4 + $0x30] sm:$0xff]  ;;  %v1096_v22 = vpack.c.bf16 %v572_v20, %v570_v19  ;;  %v776_v28 = vld [vmem:[%s1561_s7 + $0x68] sm:$0xff]  ;;  %v778_v34 = vld [vmem:[%s1561_s7 + $0x78] sm:$0xff] }
  0x1f   : > { %1061 = vmatprep.subr.bf16.mxu1 %v1060_v51  ;;  %v1074_v55 = vpack.c.bf16 %v547_v50, %v545_v49  ;;  %v747_v39 = vld [vmem:[%s1560_s6] sm:$0x3] }
  0x20   : > { %v984_v50 = vld [vmem:[%s1562_s8] ss:$0 sm:$0xff] }
  0x22   : > { %1063 = vmatpush1.bf16.msra.mxu1 %v1062_v56  ;;  %v1076_v56 = vpack.c.bf16 %v552_v53, %v550_v52 }
  0x23   : > { %1065 = vmatprep.subr.bf16.mxu1 %v1064_v57  ;;  %v549_v57 = vld [vmem:[%s1558_s4 + $0x40] sm:$0xff] }
  0x26   : > { %1067 = vmatpush1.bf16.msra.mxu1 %v1066_v60  ;;  %v556_v60 = vld [vmem:[%s1558_s4 + $0x78] sm:$0xff] }
  0xe7   : > { %v452_v4 = vpop.f32.mrb[0].mxu0 }
  0xe8   : > { %v453_v5 = vadd.f32 %v982_v3, %v452_v4  ;;  %v1030_v6 = vpop.f32.mrb[1].mxu0  ;;  %v1068_v3 = vpack.c.bf16 %v544_v2, %v542_v1  ;;  %v779_v4 = vld [vmem:[%s1561_s7 + $0x80] sm:$0xff]  ;;  %v558_v1 = vld [vmem:[%s1558_s4 + $0x88] sm:$0xff]  ;;  %v560_v2 = vld [vmem:[%s1558_s4 + $0x98] sm:$0xff] }
  0xe9   : > { %v763_v6 = vld [vmem:[%s1561_s7] sm:$0xff] }
  0xea   : > { %v457_v7 = vsel %vm456_vm1, %v453_v5, -inf  ;;  %1069 = vmatprep.subr.bf16.mxu1 %v1068_v3 }
  0xeb   : > { %458 = vmax.xlane.f32.xlu0 %v457_v7 }
 0x178   : > { %v459_v8 = vpop.xlane.xlu0 %458 }
 0x179   : > { %v460_v9 = vsub.f32 %v453_v5, %v459_v8  ;;  %v780_v5 = vld [vmem:[%s1561_s7 + $0x88] sm:$0xff] }
 0x17a   : > { %v1100_v7 = vpack.c.bf16 %v780_v5, %v779_v4  ;;  %v764_v8 = vld [vmem:[%s1561_s7 + $0x8] sm:$0xff]  ;;  %v1084_v4 = vpack.c.bf16 %v560_v2, %v558_v1  ;;  %v557_v5 = vld [vmem:[%s1558_s4 + $0x80] sm:$0xff] }
 0x17b   : > { %v461_v10 = vmul.f32 1.442695, %v460_v9  ;;  %v781_v9 = vld [vmem:[%s1561_s7 + $0x90] sm:$0xff] }
 0x17c   : > { %1101 = vmatprep.subr.bf16.mxu0 %v1100_v7  ;;  %v562_v7 = vld [vmem:[%s1558_s4 + $0xa8] sm:$0xff] }
 0x17d   : > { %1144 = vpow2.f32 %v461_v10  ;;  %v782_v10 = vld [vmem:[%s1561_s7 + $0x98] sm:$0xff] }
 0x187   : > { %v1239_v11 = vpop.eup %1144 }
 0x188   : > { %v463_v12 = vsel %vm456_vm1, %v1239_v11, 0.0 }
 0x189   : > { %464 = vadd.xlane.f32.xlu0 %v463_v12  ;;  %v1104_v12 = vpack.c.bf16 %v782_v10, %v781_v9 }
 0x216   : > { %v465_v61 = vpop.xlane.xlu0 %464 }
 0x217   : > { %1146 = vrcp.f32 %v465_v61  ;;  %v1080_v61 = vpack.c.bf16 %v556_v60, %v554_v59 }
 0x221   : > { %v1147_v62 = vpop.eup %1146 }
 0x222   : > { %v467_v63 = vmul.f32 %v1147_v62, %v1239_v11  ;;  %v1102_v11 = vpack.c.bf16 %v764_v8, %v763_v6  ;;  %v553_v62 = vld [vmem:[%s1558_s4 + $0x60] sm:$0xff]  ;;  %v559_v6 = vld [vmem:[%s1558_s4 + $0x90] sm:$0xff]  ;;  %v564_v8 = vld [vmem:[%s1558_s4 + $0xb8] sm:$0xff] }
 0x223   : > { %v1086_v9 = vpack.c.bf16 %v559_v6, %v557_v5  ;;  %v1088_v10 = vpack.c.bf16 %v564_v8, %v562_v7 }
 0x224   : > { %1034 = vmatmul.mubr.msk.f32.vlgmr.msra.gmra.mrb[2].mxu0 %vm456_vm1, %v467_v63  ;;  %v555_v63 = vld [vmem:[%s1558_s4 + $0x70] sm:$0xff] }
 0x225   : > { %1103 = vmatpush3.bf16.msra.mxu0 %v1102_v11  ;;  %v1082_v3 = vpack.c.bf16 %v555_v63, %v553_v62  ;;  %v561_v11 = vld [vmem:[%s1558_s4 + $0xa0] sm:$0xff] }
 0x226   : > { %1105 = vmatprep.subr.bf16.mxu0 %v1104_v12  ;;  %v563_v12 = vld [vmem:[%s1558_s4 + $0xb0] sm:$0xff] }
 0x227   : > { %v1090_v15 = vpack.c.bf16 %v563_v12, %v561_v11 }
 0x229   : > { %1107 = vmatpush3.bf16.msra.mxu0 %v1106_v17  ;;  %v565_v17 = vld [vmem:[%s1558_s4 + $0xc0] sm:$0xff] }
 0x22a   : > { %1109 = vmatprep.subr.bf16.mxu0 %v1108_v18  ;;  %v567_v18 = vld [vmem:[%s1558_s4 + $0xd0] sm:$0xff] }
 0x22b   : > { %v1094_v21 = vpack.c.bf16 %v567_v18, %v565_v17 }
 0x22d   : > { %1111 = vmatpush3.bf16.msra.mxu0 %v1110_v23  ;;  %v569_v23 = vld [vmem:[%s1558_s4 + $0xe0] sm:$0xff] }
 0x22e   : > { %1113 = vmatprep.subr.bf16.mxu0 %v1112_v24  ;;  %v571_v24 = vld [vmem:[%s1558_s4 + $0xf0] sm:$0xff] }
 0x22f   : > { %v1098_v25 = vpack.c.bf16 %v571_v24, %v569_v23 }
 0x231   : > { %1115 = vmatpush3.bf16.msra.mxu0 %v1114_v29  ;;  %v1126_v29 = vpack.c.bf16 %v776_v28, %v775_v27 }
 0x232   : > { %1117 = vmatprep.subr.bf16.mxu0 %v1116_v30  ;;  %v793_v30 = vld [vmem:[%s1561_s7 + $0xf0] sm:$0xff] }
 0x233   : > { %v1128_v32 = vpack.c.bf16 %v794_v31, %v793_v30 }
 0x235   : > { %1119 = vmatpush3.bf16.msra.mxu0 %v1118_v35  ;;  %v1130_v35 = vpack.c.bf16 %v778_v34, %v777_v33 }
 0x236   : > { %1121 = vmatprep.subr.bf16.mxu0 %v1120_v36  ;;  %v749_v36 = vlaneseq }
 0x238   : > { %v750_v37 = vshrl.u32 %v749_v36, 7 }
 0x239   : > { %1123 = vmatpush3.bf16.msra.mxu0 %v1122_v41 }
 0x23a   : > { %1125 = vmatprep.subr.bf16.mxu0 %v1124_v42  ;;  %v751_v38 = vsub.s32 0, %v750_v37  ;;  %v755_v40 = vsub.s32 1, %v750_v37 }
 0x23c   : > { %v752_v41 = vrot.slane %v747_v39, %v751_v38  ;;  %v756_v42 = vrot.slane %v747_v39, %v755_v40 }
 0x23d   : > { %1127 = vmatpush3.bf16.msra.mxu0 %v1126_v29 }
 0x23e   : > { %1129 = vmatprep.subr.bf16.mxu0 %v1128_v32 }
 0x241   : > { %1131 = vmatpush3.bf16.msra.mxu0 %v1130_v35 }
 0x2f7   : > { %v537_v51 = vpop.f32.mrb[2].mxu0 }
 0x2f8   : > { %v1035_v54 = vpop.f32.mrb[3].mxu0  ;;  %670 = vmatmul.mubr.f32.vlgmr.msra.gmra.mrb[0].mxu1 %v537_v51 }
 0x2f9   : > { %1071 = vmatpush1.bf16.msra.mxu1 %v1070_v47  ;;  %740 = vmatprep.mubr.f32.mxu1 %v1160_v0  ;;  %v1078_v0 = vpack.c.bf16 %v551_v58, %v549_v57 }
 0x2fa   : > { %1073 = vmatprep.subr.bf16.mxu1 %v1072_v48 }
 0x2fd   : > { %1075 = vmatpush1.bf16.msra.mxu1 %v1074_v55 }
 0x2fe   : > { %1077 = vmatprep.subr.bf16.mxu1 %v1076_v56 }
 0x301   : > { %1079 = vmatpush1.bf16.msra.mxu1 %v1078_v0 }
 0x302   : > { %1081 = vmatprep.subr.bf16.mxu1 %v1080_v61 }
 0x305   : > { %1083 = vmatpush1.bf16.msra.mxu1 %v1082_v3 }
 0x306   : > { %1085 = vmatprep.subr.bf16.mxu1 %v1084_v4 }
 0x309   : > { %1087 = vmatpush1.bf16.msra.mxu1 %v1086_v9 }
 0x30a   : > { %1089 = vmatprep.subr.bf16.mxu1 %v1088_v10 }
 0x30d   : > { %1091 = vmatpush1.bf16.msra.mxu1 %v1090_v15 }
 0x30e   : > { %1093 = vmatprep.subr.bf16.mxu1 %v1092_v16 }
 0x311   : > { %1095 = vmatpush1.bf16.msra.mxu1 %v1094_v21 }
 0x312   : > { %1097 = vmatprep.subr.bf16.mxu1 %v1096_v22 }
 0x315   : > { %1099 = vmatpush1.bf16.msra.mxu1 %v1098_v25 }
 0x318   : > { %741 = vmatmul.mubr.f32.vlgmr.msra.gmra.mrb[0].mxu1 %v376_v26 }
 0x3eb   : > { %v742_v43 = vpop.f32.mrb[0].mxu1 }
 0x3ec   : > { %v759_v44 = vadd.f32 %v752_v41, %v742_v43  ;;  %v744_v45 = vpop.f32.mrb[1].mxu1 }
 0x3ed   : > { %v760_v46 = vadd.f32 %v756_v42, %v744_v45 }
 0x3ee   : > { %v761_v48 = vmax.f32 %v759_v44, 0.0 }
 0x3ef   : > { %v762_v47 = vmax.f32 %v760_v46, 0.0 }
 0x3f1   : > { %866 = vmatprep.mubr.f32.mxu0 %v762_v47 }
 0x3f2   : > { %867 = vmatmul.mubr.f32.vlgmr.msra.gmra.mrb[4].mxu0 %v761_v48 }
 0x4c5   : > { %v1023_v49 = vpop.f32.mrb[4].mxu0 }
 0x4c6   : > { %v1024_v51 = vpop.f32.mrb[5].mxu0 }
 0x4c7   : > { %v1025_v52 = vadd.f32 %v1024_v51, %v1023_v49 }
 0x4c9   : > { %v869_v53 = vadd.f32 %v1025_v52, %v984_v50 }
 0x4cb   : > { %v873_v54 = vsel %vm872_vm2, %v869_v53, -inf }
 0x4cc   : > { %874 = vmax.xlane.f32.xlu1 %v873_v54 }
 0x559   : > { %v875_v55 = vpop.xlane.xlu1 %874 }
 0x55a   : > { %v876_v56 = vsub.f32 %v869_v53, %v875_v55 }
 0x55c   : > { %v877_v57 = vmul.f32 1.442695, %v876_v56 }
 0x55e   : > { %1148 = vpow2.f32 %v877_v57 }
 0x568   : > { %v1149_v58 = vpop.eup %1148 }
 0x569   : > { %v879_v59 = vsel %vm872_vm2, %v1149_v58, 0.0 }
 0x56a   : > { %880 = vadd.xlane.f32.xlu1 %v879_v59 }
 0x5f7   : > { %v881_v60 = vpop.xlane.xlu1 %880 }
 0x5f8   : > { %1150 = vlog2.f32 %v881_v60 }
 0x602   : > { %v1151_v0 = vpop.eup %1150 }
 0x603   : > { %v883_v61 = vmul.f32 0.6931472, %v1151_v0 }
 0x605   : > { %v884_v62 = vadd.f32 %v883_v61, %v875_v55 }
 0x607   : > { %v885_v63 = vsub.f32 %v869_v53, %v884_v62 }
 0x609   : > { %886 = vst.msk [vmem:[%s375_s13] sm:$0xff] %vm872_vm2, %v885_v63 }
 0x60a PF: > { %s19_s30 = sadd.s32 1, %s1158_s30  }
 0x60b   : > { %p16_p4 = scmp.ge.s32.totalorder %s19_s30, 5  }
 0x60d   :  { %18 = sbr.rel (!%p16_p4) target bundleno = 1 (0x1), region = 95 }

</bundles_post_ra>
